<compile_context>
chip_gen: v6e
topology: v6e:2x2x1
jax: 0.10.0
libtpu: 0.0.40
codegen_flags: <defaults>
</compile_context>

<pallas_src>
import functools

import jax
import jax.numpy as jnp
from jax.experimental import pallas as pl
from jax.experimental.pallas import tpu as pltpu


# ---------------------------------------------------------------------------
# Helpers
# ---------------------------------------------------------------------------

def _round_up(x, m):
    return ((x + m - 1) // m) * m


def _vmem_capacity_bytes():
    try:
        return int(pltpu.get_tpu_info().vmem_capacity_bytes)
    except Exception:  # pragma: no cover - conservative fallback
        return 128 * 1024 * 1024


def _sigmoid(scores_f32, approx):
    if approx:
        # exp on the EUP + approx reciprocal on the EUP: keeps the divide off
        # the VPU. Only used when the output dtype is low precision (bf16),
        # where the approximation error is below output rounding.
        return pl.reciprocal(1.0 + jnp.exp(-scores_f32), approx=True)
    return jax.nn.sigmoid(scores_f32)


# ---------------------------------------------------------------------------
# Kernels
# ---------------------------------------------------------------------------

def _full_kernel(z_ref, adj_ref, *, approx_sigmoid):
    # z_ref  : (B, N, D) VMEM
    # adj_ref: (B, N, N) VMEM
    z = z_ref[...]
    scores = jax.lax.dot_general(                       # batched NT contraction
        z, z,
        dimension_numbers=(((2,), (2,)), ((0,), (0,))),
        preferred_element_type=jnp.float32,
    )
    adj_ref[...] = _sigmoid(scores, approx_sigmoid).astype(adj_ref.dtype)


def _tiled_kernel(zi_ref, zj_ref, adj_ref, *, approx_sigmoid):
    # zi_ref : (TM, D) row tile        zj_ref : (TN, D) column tile
    # adj_ref: (TM, TN) output tile (boundary tiles are masked on store)
    scores = jax.lax.dot_general(
        zi_ref[...], zj_ref[...],
        dimension_numbers=(((1,), (1,)), ((), ())),     # NT: contract D on both
        preferred_element_type=jnp.float32,
    )
    adj_ref[...] = _sigmoid(scores, approx_sigmoid).astype(adj_ref.dtype)


# ---------------------------------------------------------------------------
# Wrappers
# ---------------------------------------------------------------------------

def _decode_full(z, out_dtype):
    """Single-shot path for small problems: one grid step, full blocks."""
    B, N, D = z.shape
    out_itemsize = jnp.dtype(out_dtype).itemsize
    approx = out_itemsize < 4
    cost = pl.CostEstimate(
        flops=2 * B * N * N * D,
        transcendentals=B * N * N,
        bytes_accessed=B * N * D * z.dtype.itemsize + B * N * N * out_itemsize,
    )
    return pl.pallas_call(
        functools.partial(_full_kernel, approx_sigmoid=approx),
        out_shape=jax.ShapeDtypeStruct((B, N, N), out_dtype),
        grid=(1,),
        in_specs=[pl.BlockSpec((B, N, D), lambda i: (0, 0, 0))],
        out_specs=pl.BlockSpec((B, N, N), lambda i: (0, 0, 0)),
        compiler_params=pltpu.CompilerParams(
            dimension_semantics=("arbitrary",),
        ),
        cost_estimate=cost,
    )(z)


def _pick_tiles(N, D, z_itemsize, out_itemsize, ws_budget):
    """Largest lane-dense (TM, TN) whose double-buffered working set fits."""
    tn = min(2048, _round_up(N, 128))   # lane dim: multiple of 128
    tm = min(1024, _round_up(N, 8))     # sublane dim: multiple of 8

    def ws(a, b):
        return 2 * a * b * out_itemsize + 2 * (a + b) * D * z_itemsize

    while ws(tm, tn) > ws_budget and tm > 8:
        tm = max(8, _round_up(tm // 2, 8))
    while ws(tm, tn) > ws_budget and tn > 128:
        tn = max(128, _round_up(tn // 2, 128))
    return tm, tn


def _decode_tiled(z, out_dtype, tm=None, tn=None):
    """Tiled path: grid=(B, cdiv(N,TM), cdiv(N,TN)); exact (B,N,N) output."""
    B, N, D = z.shape
    out_itemsize = jnp.dtype(out_dtype).itemsize

    # Generation-aware VMEM budget (v7x has 64 MiB per TC; v5e/v6e have 128).
    capacity = _vmem_capacity_bytes()
    is_v7x_like = capacity <= 96 * 1024 * 1024
    vmem_limit = (32 if is_v7x_like else 64) * 1024 * 1024
    ws_budget = (24 if is_v7x_like else 48) * 1024 * 1024

    if tm is None or tn is None:
        auto_tm, auto_tn = _pick_tiles(N, D, z.dtype.itemsize, out_itemsize,
                                       ws_budget)
        tm = auto_tm if tm is None else tm
        tn = auto_tn if tn is None else tn

    grid_i = pl.cdiv(N, tm)
    grid_j = pl.cdiv(N, tn)

    # Pad z rows so every *input* tile read is in bounds; the output keeps its
    # exact (B, N, N) shape and boundary tiles use masked stores, so no second
    # full-N^2 copy (slice) is ever made. Padded z rows are zero -> they only
    # touch output positions that are masked on writeback.
    n_pad = max(grid_i * tm, grid_j * tn)
    if n_pad != N:
        z = jnp.pad(z, ((0, 0), (0, n_pad - N), (0, 0)))

    approx = out_itemsize < 4
    cost = pl.CostEstimate(
        flops=2 * B * (grid_i * tm) * (grid_j * tn) * D,
        transcendentals=B * (grid_i * tm) * (grid_j * tn),
        bytes_accessed=(
            B * N * N * out_itemsize                              # adjacency store
            + B * grid_i * tm * D * z.dtype.itemsize              # row tiles (reused over j)
            + B * grid_i * grid_j * tn * D * z.dtype.itemsize),   # col tiles re-DMA'd per (b,i,j)
    )

    # v7x: split the row-tile axis across the two TensorCores.
    core_parallel = getattr(pltpu, "CORE_PARALLEL", None)
    if is_v7x_like and core_parallel is not None and grid_i >= 2:
        dim_sems = (pltpu.PARALLEL, core_parallel, pltpu.PARALLEL)
    else:
        dim_sems = ("parallel", "parallel", "parallel")

    return pl.pallas_call(
        functools.partial(_tiled_kernel, approx_sigmoid=approx),
        out_shape=jax.ShapeDtypeStruct((B, N, N), out_dtype),
        grid=(B, grid_i, grid_j),
        in_specs=[
            # Row tile: index constant over innermost axis j -> no re-DMA.
            pl.BlockSpec((None, tm, D), lambda b, i, j: (b, i, 0)),
            # Column tile.
            pl.BlockSpec((None, tn, D), lambda b, i, j: (b, j, 0)),
        ],
        out_specs=pl.BlockSpec((None, tm, tn), lambda b, i, j: (b, i, j)),
        compiler_params=pltpu.CompilerParams(
            dimension_semantics=dim_sems,
            vmem_limit_bytes=vmem_limit,
        ),
        cost_estimate=cost,
    )(z, z)


def inner_product_decoder(z, node_mask=None, dropout=0.0, training=False,
                          out_dtype=None, compute_in_bf16=False):
    """JAX/Pallas equivalent of InnerProductDecoder.forward (eval mode).

    z              : (B, N, D) float array
    node_mask      : unused (kept for signature parity with the PyTorch module)
    dropout        : dropout rate (identity when training=False, matching eval)
    out_dtype      : adjacency dtype; defaults to z.dtype. Strongly recommended
                     for throughput: jnp.bfloat16 (halves the dominant N^2
                     adjacency writeback; scores still accumulate in f32).
    compute_in_bf16: cast z to bf16 for the MXU operands (halves repeated
                     column-tile DMAs; native bf16 MXU path). Precision loss is
                     limited to operand rounding + the final cast.
    """
    del node_mask  # unused by the reference forward()
    assert not training, "only inference (training=False) is implemented"
    del dropout    # identity in eval mode

    B, N, D = z.shape
    out_dtype = z.dtype if out_dtype is None else jnp.dtype(out_dtype)
    if compute_in_bf16:
        z = z.astype(jnp.bfloat16)
    out_itemsize = jnp.dtype(out_dtype).itemsize

    # Dispatch: single-shot kernel when the full (double-buffered) working set
    # is tiny; otherwise the tiled, lane-dense path.
    full_vmem_bytes = 2 * (B * N * D * z.dtype.itemsize
                           + B * N * N * out_itemsize)
    if full_vmem_bytes <= 8 * 1024 * 1024:
        return _decode_full(z, out_dtype)
    return _decode_tiled(z, out_dtype)


def _reference(z):
    scores = jnp.einsum("bnd,bmd->bnm", z.astype(jnp.float32),
                        z.astype(jnp.float32))
    return jax.nn.sigmoid(scores)


if __name__ == "__main__":
    key = jax.random.PRNGKey(0)
    kz, km, kz2 = jax.random.split(key, 3)

    # --- Case 1: tiny shapes consistent with the module (single-shot path) --
    B, N, D = 2, 8, 32
    z = jax.random.normal(kz, (B, N, D), dtype=jnp.float32)
    node_mask = (jax.random.uniform(km, (B, N)) > 0.2).astype(jnp.float32)

    adj = jax.block_until_ready(
        inner_product_decoder(z, node_mask, dropout=0.5, training=False))
    ref = _reference(z)
    assert adj.shape == (B, N, N), adj.shape
    assert jnp.allclose(adj, ref, atol=1e-5, rtol=1e-5), "mismatch (full path)"

    # --- Case 2: tiled / ragged-N path, f32 output (exact epilogue) ---------
    B2, N2, D2 = 2, 200, 32
    z2 = jax.random.normal(kz2, (B2, N2, D2), dtype=jnp.float32)
    adj2 = jax.block_until_ready(_decode_tiled(z2, jnp.float32))
    ref2 = _reference(z2)
    assert adj2.shape == (B2, N2, N2), adj2.shape
    assert jnp.allclose(adj2, ref2, atol=1e-5, rtol=1e-5), "mismatch (tiled path)"

    # --- Case 3: recommended high-throughput config (bf16 out + operands) ---
    adj3 = jax.block_until_ready(
        inner_product_decoder(z2, None, out_dtype=jnp.bfloat16,
                              compute_in_bf16=True))
    assert adj3.shape == (B2, N2, N2), adj3.shape
    assert adj3.dtype == jnp.bfloat16
    err = jnp.max(jnp.abs(adj3.astype(jnp.float32) - ref2))
    assert err < 5e-2, f"bf16 path error too large: {err}"

    print("KERNEL_OK")
</pallas_src>

<mosaic_0001>
module attributes {stable_mosaic.version = 11 : i64} {
  func.func @_full_kernel(%arg0: i32, %arg1: memref<2x8x32xf32, #tpu.memory_space<vmem>>, %arg2: memref<2x8x8xf32, #tpu.memory_space<vmem>>) attributes {dimension_semantics = [#tpu.dimension_semantics<arbitrary>], iteration_bounds = array<i64: 1>, scalar_prefetch = 0 : i64, scratch_operands = 0 : i64, tpu.core_type = #tpu.core_type<tc>, window_params = [{pipeline_mode = #tpu.pipeline_mode<synchronous>, transform_indices = @transform_0, window_bounds = array<i64: 2, 8, 32>}, {pipeline_mode = #tpu.pipeline_mode<synchronous>, transform_indices = @transform_1, window_bounds = array<i64: 2, 8, 8>}]} {
    %c0 = arith.constant 0 : index
    %c0_0 = arith.constant 0 : index
    %c0_1 = arith.constant 0 : index
    %0 = vector.load %arg1[%c0, %c0_0, %c0_1] : memref<2x8x32xf32, #tpu.memory_space<vmem>>, vector<2x8x32xf32>
    %cst = arith.constant dense<0.000000e+00> : vector<2x8x8xf32>
    %1 = tpu.matmul %0, %0, %cst {dimension_numbers = #tpu.dot_dimension_numbers<[2], [2], [1], [1], [0, 0, 0, 1, 1, 1], [0], [0]>} : vector<2x8x32xf32>, vector<2x8x32xf32>, vector<2x8x8xf32> -> vector<2x8x8xf32>
    %2 = arith.negf %1 : vector<2x8x8xf32>
    %3 = math.exp %2 : vector<2x8x8xf32>
    %cst_2 = arith.constant 1.000000e+00 : f32
    %4 = vector.broadcast %cst_2 : f32 to vector<2x8x8xf32>
    %5 = arith.addf %4, %3 : vector<2x8x8xf32>
    %6 = arith.divf %4, %5 : vector<2x8x8xf32>
    %c0_3 = arith.constant 0 : index
    %c0_4 = arith.constant 0 : index
    %c0_5 = arith.constant 0 : index
    %7 = vector.load %arg2[%c0_3, %c0_4, %c0_5] : memref<2x8x8xf32, #tpu.memory_space<vmem>>, vector<2x8x8xf32>
    tpu.vector_store %arg2[%c0_3, %c0_4, %c0_5], %6 {strides = array<i32>} : memref<2x8x8xf32, #tpu.memory_space<vmem>>, vector<2x8x8xf32>,
    return
  }
  func.func @transform_0(%arg0: i32) -> (i32, i32, i32) {
    %c0_i32 = arith.constant 0 : i32
    %c0_i32_0 = arith.constant 0 : i32
    %c0_i32_1 = arith.constant 0 : i32
    %c0_i32_2 = arith.constant 0 : i32
    return %c0_i32, %c0_i32_0, %c0_i32_1 : i32, i32, i32
  }
  func.func @transform_1(%arg0: i32) -> (i32, i32, i32) {
    %c0_i32 = arith.constant 0 : i32
    %c0_i32_0 = arith.constant 0 : i32
    %c0_i32_1 = arith.constant 0 : i32
    %c0_i32_2 = arith.constant 0 : i32
    return %c0_i32, %c0_i32_0, %c0_i32_1 : i32, i32, i32
  }
}

</mosaic_0001>

<bundles_post_ra>
// kernel: tpu_custom_call.1
= control target key start
LH: loop header
LB: loop body
LE: loop exit
PB: predicated region body
PF: predicated region fallthrough
CT: control target
= control target key end

     0   :  { %6 = vsyncpa [#allocation3], 0  ;;  %s310_s0 = inlined_call_operand.hbm [shape: f32[2,8,32], index: 0, kind: input, shape index: {}]   ;;  %s311_s1 = inlined_call_operand.hbm [shape: f32[2,8,8], index: 1, kind: output, shape index: {}]  }
   0x1   :  { %7 = vsyncpa [#allocation4], 0  ;;  %s282_s6 = smov [#allocation2]  }
   0x2   :  { %s13_s7 = sshll.u32 %s282_s6, 4  ;;  %s14_s7 = int_to_ptr.vmem [resolvable:$true] %s13_s7 }
   0x3   :  { %s246_s8 = scalar_lea.vmem %s14_s7, 256  ;;  %p251_p1 = scmp.lt.s32.totalorder %s14_s7, %s14_s7 }
   0x4   :  { %p247_p0 = scmp.ne.s32.totalorder %s14_s7, %s246_s8  ;;  %p252_p2 = scmp.lt.s32.totalorder %s246_s8, %s246_s8 }
   0x6   :  { %p253_p3 = por %p252_p2, %p251_p1 }
   0x8   :  { %p254_p4 = pnand %p253_p3, %p247_p0 }
   0xa   :  { %257 = shalt.err (!%p254_p4)
}
   0xb   :  { %s283_s9 = smov 128   ;;  %s284_s10 = smov 8  }
   0xc   :  { %19 = dma.hbm_to_vmem [thread:$0]  %s310_s0, 256, %s14_s7, [#allocation3], %s283_s9, %s283_s9, %s284_s10  }
   0xd   :  { %278 = dma.done.wait [#allocation3], 256  }
   0xe   :  { %279 = vsyncadd [#allocation3], 4294967040  ;;  %v285_v0 = vmov 0.0   ;;  %vm286_vm0 = vmmov 0   ;;  %vm25_vm1 = vcmask 261120   ;;  %v23_v1 = vld [vmem:[#allocation2] sm:$0xff] }
   0xf   :  { %214 = vmatprep.subr.mxu0 %v285_v0  ;;  %219 = vmatprep.subr.mxu1 %v285_v0  ;;  %v24_v2 = vld [vmem:[#allocation2 + $0x8] sm:$0xff]  ;;  %s287_s0 = smov [#allocation5]   ;;  %vm184_vm2 = vcmask 64512  }
  0x10   :  { %216 = vmatprep.mubr.msk.f32.mxu0 %vm286_vm0, %v285_v0  ;;  %221 = vmatprep.mubr.msk.f32.mxu1 %vm286_vm0, %v285_v0  ;;  %s192_s13 = sshll.u32 %s287_s0, 4  ;;  %s193_s13 = int_to_ptr.vmem [resolvable:$true] %s192_s13 }
  0x11   :  { %215 = vmatpush3.xpose.msk.msra.mxu0 %vm25_vm1, %v23_v1  ;;  %220 = vmatpush3.xpose.msk.msra.mxu1 %vm25_vm1, %v24_v2  ;;  %s258_s14 = scalar_lea.vmem %s193_s13, 256  ;;  %p263_p6 = scmp.lt.s32.totalorder %s193_s13, %s193_s13 }
  0x12   :  { %p259_p5 = scmp.ne.s32.totalorder %s193_s13, %s258_s14  ;;  %p264_p7 = scmp.lt.s32.totalorder %s258_s14, %s258_s14 }
  0x14   :  { %217 = vmatmul.mubr.msk.f32.vlgmr.msra.gmra.mxu0 %vm25_vm1, %v23_v1  ;;  %222 = vmatmul.mubr.msk.f32.vlgmr.msra.gmra.mxu1 %vm25_vm1, %v24_v2  ;;  %p265_p8 = por %p264_p7, %p263_p6 }
  0x16   :  { %p266_p9 = pnand %p265_p8, %p259_p5 }
  0xd4   :  { %v95_v3 = vpop.f32.mrf.mxu0  ;;  %v168_v4 = vpop.f32.mrf.mxu1 }
  0xd5   :  { %v208_v5 = vmul.f32 -1.442695, %v95_v3  ;;  %v209_v6 = vmul.f32 -1.442695, %v168_v4 }
  0xd6   :  { %v218_v7 = vpop.f32.mrf.mxu0  ;;  %v223_v8 = vpop.f32.mrf.mxu1 }
  0xd7   :  { %230 = vpow2.f32 %v208_v5 }
  0xd8   :  { %232 = vpow2.f32 %v209_v6 }
  0xe4   :  { %v231_v9 = vpop.eup %230 }
  0xe5   :  { %v233_v10 = vpop.eup %232  ;;  %v178_v11 = vadd.f32 1.0, %v231_v9 }
  0xe6   :  { %v179_v12 = vadd.f32 1.0, %v233_v10 }
  0xe7   :  { %234 = vrcp.f32 %v178_v11 }
  0xe8   :  { %236 = vrcp.f32 %v179_v12 }
  0xf4   :  { %v235_v13 = vpop.eup %234 }
  0xf5   :  { %v237_v14 = vpop.eup %236  ;;  %185 = vst.msk [vmem:[#allocation5] sm:$0xff] %vm184_vm2, %v235_v13 }
  0xf6   :  { %186 = vst.msk [vmem:[#allocation5 + $0x8] sm:$0xff] %vm184_vm2, %v237_v14 }
  0xf7   :  { %269 = shalt.err (!%p266_p9)
}
  0xf8   :  { %198 = dma.vmem_to_hbm [thread:$0]  %s193_s13, 256, %s311_s1, [#allocation4], %s283_s9, %s283_s9, %s284_s10  }
  0xf9   :  { %280 = dma.done.wait [#allocation4], 256  }
  0xfa   :  { %281 = vsyncadd [#allocation4], 4294967040 }
  0xfb   :  { %202 = vsyncpa [#allocation3], 1 }
  0xfc   :  { %203 = vsyncpa [#allocation4], 1 }

</bundles_post_ra>
